<compile_context>
chip_gen: v7x
topology: tpu7x:2x2x1
jax: 0.10.0
libtpu: 0.0.40
codegen_flags: <defaults>
</compile_context>

<pallas_src>
import math
import jax
import jax.numpy as jnp
from jax.experimental import pallas as pl
from jax.experimental.pallas import tpu as pltpu


def _round_up(a, b):
    return (a + b - 1) // b * b


def _cdiv(a, b):
    return -(-a // b)


def _vmem_capacity_bytes():
    """Per-core VMEM capacity, with a v7x-safe fallback if the query is unavailable."""
    try:
        info = pltpu.get_tpu_info()
        cap = getattr(info, "vmem_capacity_bytes", None)
        if cap:
            return max(int(cap), 32 << 20)
    except Exception:
        pass
    return 64 << 20  # conservative: v7x per-TensorCore VMEM


def gaussian_taps_1d(kernel_size, sigma):
    """Normalized 1-D Gaussian taps as plain Python floats (compile-time constants)."""
    mean = (kernel_size - 1) / 2.0
    taps = [
        1.0 / (sigma * math.sqrt(2.0 * math.pi))
        * math.exp(-(((i - mean) / sigma) ** 2) / 2.0)
        for i in range(kernel_size)
    ]
    s = sum(taps)
    return [t / s for t in taps]


def gaussian_kernel_2d(kernel_size, sigma, dim=2):
    """Replicates the PyTorch __init__ math for the (K, K) Gaussian buffer (reference only)."""
    if isinstance(kernel_size, (int, float)):
        kernel_size = [kernel_size] * dim
    if isinstance(sigma, (int, float)):
        sigma = [sigma] * dim
    kernel = jnp.array(1.0, jnp.float32)
    meshgrids = jnp.meshgrid(
        *[jnp.arange(s, dtype=jnp.float32) for s in kernel_size], indexing="ij"
    )
    for size, std, mgrid in zip(kernel_size, sigma, meshgrids):
        mean = (size - 1) / 2.0
        kernel = kernel * (
            1.0 / (std * math.sqrt(2.0 * math.pi))
            * jnp.exp(-(((mgrid - mean) / std) ** 2) / 2.0)
        )
    kernel = kernel / jnp.sum(kernel)
    return kernel  # (K, K); identical for every channel (depthwise repeat)


def _make_kernel(taps_h, taps_w, Ho, Wo, Wo_out):
    Kh, Kw = len(taps_h), len(taps_w)

    def kernel(x_ref, o_ref, tmp_ref):
        # x_ref: VMEM [bn, H, W]; o_ref: VMEM [bn, Ho, Wo_out]; tmp_ref: VMEM f32 [bn, H, Wo_out]
        in_is_f32 = jnp.dtype(x_ref.dtype) == jnp.float32
        x = x_ref[...] if in_is_f32 else None  # single load when no widening is needed

        def tap_w(j):
            if in_is_f32:
                return x[:, :, j:j + Wo]
            # Sub-32-bit inputs: read + cast per tap slice; no full widened f32 copy.
            return x_ref[:, :, j:j + Wo].astype(jnp.float32)

        # ---- horizontal pass (lane axis): Kw taps -> (bn, H, Wo) ----
        th = taps_w[0] * tap_w(0)
        for j in range(1, Kw):
            th = th + taps_w[j] * tap_w(j)

        # ---- stage into lane-dense VMEM scratch (zero the lane padding) ----
        if Wo_out != Wo:
            tmp_ref[...] = jnp.zeros_like(tmp_ref)   # deterministic padded columns
            tmp_ref[:, :, 0:Wo] = th                 # masked store only into VMEM scratch
        else:
            tmp_ref[...] = th

        # ---- vertical pass (sublane axis): Kh sublane-offset *ref* slices -> vector loads ----
        acc = taps_h[0] * tmp_ref[:, 0:Ho, :]
        for i in range(1, Kh):
            acc = acc + taps_h[i] * tmp_ref[:, i:i + Ho, :]

        o_ref[...] = acc.astype(o_ref.dtype)         # one lane-dense store per step

    return kernel


def gaussian_smoothing(x, kernel_size, sigma):
    """Depthwise 'valid' 2D Gaussian convolution of NCHW input (shared kernel per channel)."""
    B, C, H, W = x.shape
    K = int(kernel_size)
    Ho, Wo = H - K + 1, W - K + 1
    assert Ho >= 1 and Wo >= 1, "kernel larger than the image"

    taps = gaussian_taps_1d(K, float(sigma))  # same sigma/size in both dims (like the module)

    N = B * C
    x_flat = x.reshape(N, H, W)

    # Lane-dense output block: pad Wo up to one full vreg row when it is narrower than 128.
    Wo_out = Wo if Wo >= 128 else 128

    # ---- VMEM budgeting with (8,128)-padded tile sizes, per TPU generation ----
    cap = _vmem_capacity_bytes()
    vmem_limit = int(cap * 3 // 4)     # ~48 MiB on v7x, ~96 MiB on v5e/v6e (25% headroom)
    step_budget = int(cap * 3 // 10)   # per-step working-set target (~19 / ~38 MiB)

    itemsize = jnp.dtype(x.dtype).itemsize
    Hs, Hos = _round_up(H, 8), _round_up(Ho, 8)
    Wl, Wol = _round_up(W, 128), _round_up(Wo_out, 128)
    per_img = (2 * Hs * Wl * itemsize       # double-buffered input block
               + Hs * Wl * 4                # in-kernel f32 view of the block
               + Hs * Wol * 4               # horizontal-pass scratch (f32)
               + Hos * Wol * 4              # vertical accumulator (f32)
               + 2 * Hos * Wol * itemsize)  # double-buffered output block
    max_bn = max(1, step_budget // per_img)
    bn = max(1, min(N, max_bn))
    if N >= 2:
        # >=2 grid steps so the "parallel" axis can shard across both v7x TensorCores
        # (costs ~0.35us of extra per-step overhead on single-core v5e/v6e: negligible).
        bn = min(bn, _cdiv(N, 2))
    grid_n = _cdiv(N, bn)
    Npad = grid_n * bn
    if Npad != N:
        x_flat = jnp.pad(x_flat, ((0, Npad - N), (0, 0), (0, 0)))

    cost = pl.CostEstimate(
        flops=int(2 * K * Npad * (H * Wo + Ho * Wo_out)),
        transcendentals=0,
        bytes_accessed=int(Npad * (H * W + Ho * Wo_out) * itemsize),
    )

    out_flat = pl.pallas_call(
        _make_kernel(taps, taps, Ho, Wo, Wo_out),
        out_shape=jax.ShapeDtypeStruct((Npad, Ho, Wo_out), x.dtype),
        grid=(grid_n,),
        in_specs=[pl.BlockSpec((bn, H, W), lambda n: (n, 0, 0))],
        out_specs=pl.BlockSpec((bn, Ho, Wo_out), lambda n: (n, 0, 0)),
        scratch_shapes=[pltpu.VMEM((bn, H, Wo_out), jnp.float32)],
        compiler_params=pltpu.CompilerParams(
            dimension_semantics=("parallel",),
            vmem_limit_bytes=vmem_limit,
        ),
        cost_estimate=cost,
    )(x_flat)

    out = out_flat[:N, :, :Wo]   # drop batch tail + lane padding
    return out.reshape(B, C, Ho, Wo)


if __name__ == "__main__":
    # Module config (synthetic, deterministic): channels=4, kernel_size=5, sigma=1.5, dim=2
    B, C, H, W = 2, 4, 16, 16
    K = 5
    sigma = 1.5

    key = jax.random.PRNGKey(0)
    x = jax.random.normal(key, (B, C, H, W), dtype=jnp.float32)

    y = gaussian_smoothing(x, K, sigma)
    y = jax.block_until_ready(y)

    # Reference: grouped (depthwise) conv, valid padding, same as F.conv2d(..., groups=C)
    weight2d = gaussian_kernel_2d(K, sigma, dim=2)
    w_depthwise = jnp.broadcast_to(weight2d[None, None], (C, 1, K, K))
    y_ref = jax.lax.conv_general_dilated(
        x, w_depthwise,
        window_strides=(1, 1), padding="VALID",
        dimension_numbers=("NCHW", "OIHW", "NCHW"),
        feature_group_count=C,
        precision=jax.lax.Precision.HIGHEST,
    )

    assert y.shape == (B, C, H - K + 1, W - K + 1), y.shape
    err = float(jnp.max(jnp.abs(y - y_ref)))
    assert jnp.allclose(y, y_ref, atol=1e-5, rtol=1e-5), err
    print("KERNEL_OK")
</pallas_src>

<mosaic_0001>
module attributes {stable_mosaic.version = 11 : i64} {
  func.func @kernel(%arg0: i32, %arg1: memref<4x16x16xf32, #tpu.memory_space<vmem>>, %arg2: memref<4x12x128xf32, #tpu.memory_space<vmem>>, %arg3: memref<4x16x128xf32, #tpu.memory_space<vmem>>) attributes {dimension_semantics = [#tpu.dimension_semantics<parallel>], iteration_bounds = array<i64: 2>, scalar_prefetch = 0 : i64, scratch_operands = 1 : i64, tpu.core_type = #tpu.core_type<tc>, window_params = [{transform_indices = @transform_0, window_bounds = array<i64: 4, 16, 16>}, {transform_indices = @transform_1, window_bounds = array<i64: 4, 12, 128>}]} {
    %c0 = arith.constant 0 : index
    %c0_0 = arith.constant 0 : index
    %c0_1 = arith.constant 0 : index
    %0 = vector.load %arg1[%c0, %c0_0, %c0_1] : memref<4x16x16xf32, #tpu.memory_space<vmem>>, vector<4x16x16xf32>
    %1 = vector.extract_strided_slice %0 {offsets = [0, 0, 0], sizes = [4, 16, 12], strides = [1, 1, 1]} : vector<4x16x16xf32> to vector<4x16x12xf32>
    %cst = arith.constant 0.120078385 : f32
    %2 = vector.broadcast %cst : f32 to vector<4x16x12xf32>
    %3 = arith.mulf %2, %1 : vector<4x16x12xf32>
    %4 = vector.extract_strided_slice %0 {offsets = [0, 0, 1], sizes = [4, 16, 12], strides = [1, 1, 1]} : vector<4x16x16xf32> to vector<4x16x12xf32>
    %cst_2 = arith.constant 0.233880758 : f32
    %5 = vector.broadcast %cst_2 : f32 to vector<4x16x12xf32>
    %6 = arith.mulf %5, %4 : vector<4x16x12xf32>
    %7 = arith.addf %3, %6 : vector<4x16x12xf32>
    %8 = vector.extract_strided_slice %0 {offsets = [0, 0, 2], sizes = [4, 16, 12], strides = [1, 1, 1]} : vector<4x16x16xf32> to vector<4x16x12xf32>
    %cst_3 = arith.constant 0.292081714 : f32
    %9 = vector.broadcast %cst_3 : f32 to vector<4x16x12xf32>
    %10 = arith.mulf %9, %8 : vector<4x16x12xf32>
    %11 = arith.addf %7, %10 : vector<4x16x12xf32>
    %12 = vector.extract_strided_slice %0 {offsets = [0, 0, 3], sizes = [4, 16, 12], strides = [1, 1, 1]} : vector<4x16x16xf32> to vector<4x16x12xf32>
    %cst_4 = arith.constant 0.233880758 : f32
    %13 = vector.broadcast %cst_4 : f32 to vector<4x16x12xf32>
    %14 = arith.mulf %13, %12 : vector<4x16x12xf32>
    %15 = arith.addf %11, %14 : vector<4x16x12xf32>
    %16 = vector.extract_strided_slice %0 {offsets = [0, 0, 4], sizes = [4, 16, 12], strides = [1, 1, 1]} : vector<4x16x16xf32> to vector<4x16x12xf32>
    %cst_5 = arith.constant 0.120078385 : f32
    %17 = vector.broadcast %cst_5 : f32 to vector<4x16x12xf32>
    %18 = arith.mulf %17, %16 : vector<4x16x12xf32>
    %19 = arith.addf %15, %18 : vector<4x16x12xf32>
    %cst_6 = arith.constant 0.000000e+00 : f32
    %20 = vector.broadcast %cst_6 : f32 to vector<4x16x128xf32>
    %c0_7 = arith.constant 0 : index
    %c0_8 = arith.constant 0 : index
    %c0_9 = arith.constant 0 : index
    %21 = vector.load %arg3[%c0_7, %c0_8, %c0_9] : memref<4x16x128xf32, #tpu.memory_space<vmem>>, vector<4x16x128xf32>
    tpu.vector_store %arg3[%c0_7, %c0_8, %c0_9], %20 {strides = array<i32>} : memref<4x16x128xf32, #tpu.memory_space<vmem>>, vector<4x16x128xf32>,
    %c0_10 = arith.constant 0 : index
    %c0_11 = arith.constant 0 : index
    %c0_12 = arith.constant 0 : index
    %22 = vector.load %arg3[%c0_10, %c0_11, %c0_12] : memref<4x16x128xf32, #tpu.memory_space<vmem>>, vector<4x16x12xf32>
    tpu.vector_store %arg3[%c0_10, %c0_11, %c0_12], %19 {strides = array<i32>} : memref<4x16x128xf32, #tpu.memory_space<vmem>>, vector<4x16x12xf32>,
    %c0_13 = arith.constant 0 : index
    %c0_14 = arith.constant 0 : index
    %c0_15 = arith.constant 0 : index
    %23 = vector.load %arg3[%c0_13, %c0_14, %c0_15] : memref<4x16x128xf32, #tpu.memory_space<vmem>>, vector<4x12x128xf32>
    %cst_16 = arith.constant 0.120078385 : f32
    %24 = vector.broadcast %cst_16 : f32 to vector<4x12x128xf32>
    %25 = arith.mulf %24, %23 : vector<4x12x128xf32>
    %c0_17 = arith.constant 0 : index
    %c1 = arith.constant 1 : index
    %c0_18 = arith.constant 0 : index
    %26 = vector.load %arg3[%c0_17, %c1, %c0_18] : memref<4x16x128xf32, #tpu.memory_space<vmem>>, vector<4x12x128xf32>
    %cst_19 = arith.constant 0.233880758 : f32
    %27 = vector.broadcast %cst_19 : f32 to vector<4x12x128xf32>
    %28 = arith.mulf %27, %26 : vector<4x12x128xf32>
    %29 = arith.addf %25, %28 : vector<4x12x128xf32>
    %c0_20 = arith.constant 0 : index
    %c2 = arith.constant 2 : index
    %c0_21 = arith.constant 0 : index
    %30 = vector.load %arg3[%c0_20, %c2, %c0_21] : memref<4x16x128xf32, #tpu.memory_space<vmem>>, vector<4x12x128xf32>
    %cst_22 = arith.constant 0.292081714 : f32
    %31 = vector.broadcast %cst_22 : f32 to vector<4x12x128xf32>
    %32 = arith.mulf %31, %30 : vector<4x12x128xf32>
    %33 = arith.addf %29, %32 : vector<4x12x128xf32>
    %c0_23 = arith.constant 0 : index
    %c3 = arith.constant 3 : index
    %c0_24 = arith.constant 0 : index
    %34 = vector.load %arg3[%c0_23, %c3, %c0_24] : memref<4x16x128xf32, #tpu.memory_space<vmem>>, vector<4x12x128xf32>
    %cst_25 = arith.constant 0.233880758 : f32
    %35 = vector.broadcast %cst_25 : f32 to vector<4x12x128xf32>
    %36 = arith.mulf %35, %34 : vector<4x12x128xf32>
    %37 = arith.addf %33, %36 : vector<4x12x128xf32>
    %c0_26 = arith.constant 0 : index
    %c4 = arith.constant 4 : index
    %c0_27 = arith.constant 0 : index
    %38 = vector.load %arg3[%c0_26, %c4, %c0_27] : memref<4x16x128xf32, #tpu.memory_space<vmem>>, vector<4x12x128xf32>
    %cst_28 = arith.constant 0.120078385 : f32
    %39 = vector.broadcast %cst_28 : f32 to vector<4x12x128xf32>
    %40 = arith.mulf %39, %38 : vector<4x12x128xf32>
    %41 = arith.addf %37, %40 : vector<4x12x128xf32>
    %c0_29 = arith.constant 0 : index
    %c0_30 = arith.constant 0 : index
    %c0_31 = arith.constant 0 : index
    %42 = vector.load %arg2[%c0_29, %c0_30, %c0_31] : memref<4x12x128xf32, #tpu.memory_space<vmem>>, vector<4x12x128xf32>
    tpu.vector_store %arg2[%c0_29, %c0_30, %c0_31], %41 {strides = array<i32>} : memref<4x12x128xf32, #tpu.memory_space<vmem>>, vector<4x12x128xf32>,
    return
  }
  func.func @transform_0(%arg0: i32) -> (i32, i32, i32) {
    %c0_i32 = arith.constant 0 : i32
    %c0_i32_0 = arith.constant 0 : i32
    %c0_i32_1 = arith.constant 0 : i32
    return %arg0, %c0_i32, %c0_i32_0 : i32, i32, i32
  }
  func.func @transform_1(%arg0: i32) -> (i32, i32, i32) {
    %c0_i32 = arith.constant 0 : i32
    %c0_i32_0 = arith.constant 0 : i32
    %c0_i32_1 = arith.constant 0 : i32
    return %arg0, %c0_i32, %c0_i32_0 : i32, i32, i32
  }
}

</mosaic_0001>

<bundles_post_ra>
// kernel: tpu_custom_call.1
= control target key start
LH: loop header
LB: loop body
LE: loop exit
PB: predicated region body
PF: predicated region fallthrough
CT: control target
= control target key end

     0   :  { %6 = vsyncpa [#allocation4], 0  ;;  %s817_s0 = inlined_call_operand.hbm [shape: f32[8,16,16], index: 0, kind: input, shape index: {}]   ;;  %s818_s1 = inlined_call_operand.vmem [shape: f32[8,12,128], index: 1, kind: output, shape index: {}]  }
   0x1   :  { %8 = vsyncpa [#allocation4 + $0x1], 0  ;;  %s680_s6 = smov 0   ;;  %s682_s7 = smov 0  }
   0x2   :  { %s684_s8 = smov 0   ;;  %s686_s9 = smov 0  }
   0x3 LB: > { %s532_s10 = sadd.s32 4294967295, %s660_s9   ;;  %s700_s11 = sadd.s32 1, %s660_s9   ;;  %s660_s9 = sphi %s686_s9, %s825_s9   ;;  %s656_s8 = sphi %s684_s8, %s824_s8   ;;  %s652_s7 = sphi %s682_s7, %s823_s7   ;;  %s648_s6 = sphi %s680_s6, %s822_s6  }
   0x4   : > { %s18_s12 = ssub.s32 %s660_s9, %s700_s11  ;;  %s21_s13 = sadd.s32 1, %s656_s8 }
   0x5   : > { %p19_p0 = scmp.eq.s32.totalorder %s18_s12, 0  ;;  %p28_p1 = scmp.ne.s32.totalorder %s656_s8, %s652_s7 }
   0x6   : > { %p29_p2 = scmp.eq.s32.totalorder %s660_s9, 0  ;;  %p34_p3 = scmp.ne.s32.totalorder %s652_s7, %s648_s6 }
   0x7   : > { %s710_s14 = scalar_select %p19_p0, %s656_s8, %s21_s13  }
   0x8   : > { %p30_p4 = por %p29_p2, %p28_p1  ;;  %p35_p5 = scmp.eq.s32.totalorder %s532_s10, 0 }
   0x9   : > { %p556_p6 = scmp.lt.s32.totalorder %s660_s9, 2  ;;  %s84_s16 = sand.u32 1, %s656_s8  }
   0xa   : > { %p715_p7 = por %p35_p5, %p34_p3  ;;  %s536_s17 = sshll.u32 %s84_s16, 6 }
   0xb   : > { %s548_s18 = sshll.u32 %s660_s9, 10  ;;  %s88_s22 = scalar_lea.vmem [#allocation3], %s536_s17 }
   0xc   : > { %s724_s21 = scalar_lea.hbm %s817_s0, %s548_s18  ;;  %s96_s23 = sshll.u32 %s88_s22, 4  ;;  %s726_s23 = int_to_ptr.vmem [resolvable:$true] %s96_s23 }
   0xd   : > { %p728_p8 = pnand %p556_p6, %p30_p4  ;;  %s733_s25 = scalar_lea.sflag [#allocation4], %s84_s16 }
   0xe   : > { %s596_s26 = scalar_lea.hbm %s724_s21, 1024  ;;  %s601_s29 = scalar_lea.hbm %s817_s0, 2048 }
   0xf   : > { %p597_p10 = scmp.ne.s32.totalorder %s724_s21, %s596_s26  ;;  %p598_p11 = pneg %p728_p8 }
  0x10   : > { %p602_p0 = scmp.lt.u32.totalorder %s724_s21, %s817_s0  ;;  %p603_p1 = scmp.lt.u32.totalorder %s601_s29, %s596_s26 }
  0x11   : > { %p599_p12 = pnand %p598_p11, %p597_p10  ;;  %p605_p3 = scmp.lt.u32.totalorder %s596_s26, %s724_s21 }
  0x12   : > { %p604_p2 = por %p603_p1, %p602_p0 }
  0x13   : > { %p600_p13 = pneg %p599_p12 }
  0x14   : > { %p606_p4 = por %p605_p3, %p604_p2 }
  0x16   : > { %p607_p5 = pnand %p606_p4, %p600_p13 }
  0x18   : > { %610 = shalt.err (!%p607_p5)
}
  0x19   : > { %s611_s3 = scalar_lea.vmem %s726_s23, 1024  ;;  %s662_s4 = smov [#allocation3]  }
  0x1a   : > { %p612_p6 = scmp.ne.s32.totalorder %s726_s23, %s611_s3  ;;  %s616_s5 = sshll.u32 %s662_s4, 4  ;;  %s617_s5 = int_to_ptr.vmem [resolvable:$false] %s616_s5 }
  0x1b   : > { %s618_s6 = scalar_lea.vmem %s617_s5, 2048  ;;  %p619_p9 = scmp.lt.s32.totalorder %s726_s23, %s617_s5 }
  0x1c   : > { %p614_p10 = pnand %p612_p6, %p598_p11  ;;  %p620_p0 = scmp.lt.s32.totalorder %s618_s6, %s611_s3 }
  0x1e   : > { %p615_p12 = pneg %p614_p10  ;;  %p621_p1 = por %p620_p0, %p619_p9 }
  0x20   : > { %p622_p2 = pnand %p621_p1, %p615_p12 }
  0x22   : > { %625 = shalt.err (!%p622_p2)
}
  0x23   : > { %s663_s12 = smov 128   ;;  %s664_s13 = smov 8  }
  0x24   : > { %555 = dma.hbm_to_vmem [thread:$0]  (!%p728_p8), %s724_s21, 1024, %s726_s23, %s733_s25, %s663_s12, %s663_s12, %s664_s13  }
  0x25   : > { %p104_p11 = scmp.lt.s32.totalorder %s660_s9, 3  ;;  %p821_p13 = scmp.ge.s32.totalorder %s660_s9, 1 }
  0x27   : > { %p105_p3 = pnand %p821_p13, %p104_p11 }
  0x28   : > { %s110_s16 = sand.u32 (!%p105_p3), 1, %s652_s7  }
  0x29   : > { %108 = sbr.rel (%p105_p3) target bundleno = 255 (0xff), region = 24  ;;  %s541_s17 = sshll.u32 (!%p105_p3), %s110_s16, 6 }
  0x2a   : > { %s111_s18 = scalar_lea.sflag (!%p105_p3), [#allocation4], %s110_s16  ;;  %s114_s19 = scalar_lea.vmem (!%p105_p3), [#allocation3], %s541_s17 }
  0x30   : > { %643 = dma.done.wait (%p715_p7), %s111_s18, 1024  }
  0x31   : > { %645 = vsyncadd (%p715_p7), %s111_s18, 4294966272  ;;  %v769_v0 = vld [vmem:[%s114_s19 + $0x10] sm:$0xff]  ;;  %v142_v1 = vld [vmem:[%s114_s19] sm:$0xff]  ;;  %s665_s20 = smov 127   ;;  %s666_s15 = smov 126   ;;  %v668_v24 = vmov 0.0  }
  0x32   : > { %v145_v2 = vld [vmem:[%s114_s19 + $0x18] sm:$0xff]  ;;  %v160_v3 = vmul.f32 0.23388076, %v769_v0  ;;  %v158_v4 = vmul.f32 0.23388076, %v142_v1  ;;  %v143_v5 = vld [vmem:[%s114_s19 + $0x8] sm:$0xff] }
  0x33   : > { %v161_v6 = vmul.f32 0.23388076, %v145_v2  ;;  %v159_v7 = vmul.f32 0.23388076, %v143_v5  ;;  %v147_v8 = vld [vmem:[%s114_s19 + $0x28] sm:$0xff]  ;;  %v146_v9 = vld [vmem:[%s114_s19 + $0x20] sm:$0xff] }
  0x34   : > { %178 = vrot.lane.b32.xlu1 %v160_v3, %s665_s20  ;;  %174 = vrot.lane.b32.xlu0 %v158_v4, %s665_s20  ;;  %v163_v10 = vmul.f32 0.23388076, %v147_v8  ;;  %v162_v11 = vmul.f32 0.23388076, %v146_v9  ;;  %v207_v12 = vmul.f32 0.2920817, %v143_v5 }
  0x35   : > { %v206_v13 = vmul.f32 0.2920817, %v142_v1  ;;  %v149_v14 = vld [vmem:[%s114_s19 + $0x38] sm:$0xff]  ;;  %v148_v15 = vld [vmem:[%s114_s19 + $0x30] sm:$0xff]  ;;  %v209_v18 = vmul.f32 0.2920817, %v145_v2 }
  0x36   : > { %v165_v16 = vmul.f32 0.23388076, %v149_v14  ;;  %v164_v17 = vmul.f32 0.23388076, %v148_v15  ;;  %v208_v19 = vmul.f32 0.2920817, %v769_v0 }
  0x37   : > { %v211_v20 = vmul.f32 0.2920817, %v147_v8  ;;  %v210_v21 = vmul.f32 0.2920817, %v146_v9  ;;  %s667_s21 = smov 125   ;;  %327 = vst [vmem:[#allocation2 + $0x8] sm:$0xff] %v668_v24 }
  0x38   : > { %180 = vrot.lane.b32.xlu1 %v161_v6, %s665_s20  ;;  %176 = vrot.lane.b32.xlu0 %v159_v7, %s665_s20  ;;  %v213_v22 = vmul.f32 0.2920817, %v149_v14  ;;  %v212_v23 = vmul.f32 0.2920817, %v148_v15  ;;  %326 = vst [vmem:[#allocation2] sm:$0xff] %v668_v24  ;;  %328 = vst [vmem:[#allocation2 + $0x10] sm:$0xff] %v668_v24 }
  0x39   : > { %329 = vst [vmem:[#allocation2 + $0x18] sm:$0xff] %v668_v24  ;;  %330 = vst [vmem:[#allocation2 + $0x20] sm:$0xff] %v668_v24  ;;  %v151_v25 = vmul.f32 0.120078385, %v143_v5  ;;  %v150_v26 = vmul.f32 0.120078385, %v142_v1 }
  0x3a   : > { %331 = vst [vmem:[#allocation2 + $0x28] sm:$0xff] %v668_v24  ;;  %332 = vst [vmem:[#allocation2 + $0x30] sm:$0xff] %v668_v24  ;;  %s669_s22 = smov 124   ;;  %v153_v27 = vmul.f32 0.120078385, %v145_v2  ;;  %vm334_vm0 = vcmask 97280  }
  0x3b   : > { %333 = vst [vmem:[#allocation2 + $0x38] sm:$0xff] %v668_v24  ;;  %v152_v28 = vmul.f32 0.120078385, %v769_v0  ;;  %v155_v29 = vmul.f32 0.120078385, %v147_v8  ;;  %s542_s23 = sshll.u32 %s532_s10, 2 }
  0x3c   : > { %184 = vrot.lane.b32.xlu1 %v163_v10, %s665_s20  ;;  %182 = vrot.lane.b32.xlu0 %v162_v11, %s665_s20  ;;  %v154_v30 = vmul.f32 0.120078385, %v146_v9  ;;  %v157_v31 = vmul.f32 0.120078385, %v149_v14  ;;  %v774_v32 = vmul.f32 0.120078385, %v148_v15 }
  0x3d   : > { %p136_p7 = scmp.lt.s32.totalorder %s542_s23, 7 }
  0x3f   : > { %s827_s23 = smov (!%p136_p7, %s542_s23), 7 }
  0x40   : > { %224 = vrot.lane.b32.xlu1 %v207_v12, %s666_s15  ;;  %222 = vrot.lane.b32.xlu0 %v206_v13, %s666_s15  ;;  %s549_s9 = sshll.u32 %s827_s23, 4 }
  0x41   : > { %s792_s25 = scalar_lea.vmem %s818_s1, %s549_s9 }
  0x44   : > { %188 = vrot.lane.b32.xlu1 %v165_v16, %s665_s20  ;;  %186 = vrot.lane.b32.xlu0 %v164_v17, %s665_s20 }
  0x48   : > { %228 = vrot.lane.b32.xlu1 %v209_v18, %s666_s15  ;;  %226 = vrot.lane.b32.xlu0 %v208_v19, %s666_s15 }
  0x4c   : > { %232 = vrot.lane.b32.xlu1 %v211_v20, %s666_s15  ;;  %230 = vrot.lane.b32.xlu0 %v210_v21, %s666_s15 }
  0x50   : > { %256 = vrot.lane.b32.xlu1 %v159_v7, %s667_s21  ;;  %254 = vrot.lane.b32.xlu0 %v158_v4, %s667_s21 }
  0x54   : > { %236 = vrot.lane.b32.xlu1 %v213_v22, %s666_s15  ;;  %234 = vrot.lane.b32.xlu0 %v212_v23, %s666_s15 }
  0x58   : > { %260 = vrot.lane.b32.xlu1 %v161_v6, %s667_s21  ;;  %258 = vrot.lane.b32.xlu0 %v160_v3, %s667_s21 }
  0x5c   : > { %264 = vrot.lane.b32.xlu1 %v163_v10, %s667_s21  ;;  %262 = vrot.lane.b32.xlu0 %v162_v11, %s667_s21 }
  0x60   : > { %296 = vrot.lane.b32.xlu1 %v151_v25, %s669_s22  ;;  %294 = vrot.lane.b32.xlu0 %v150_v26, %s669_s22 }
  0x64   : > { %268 = vrot.lane.b32.xlu1 %v165_v16, %s667_s21  ;;  %266 = vrot.lane.b32.xlu0 %v164_v17, %s667_s21 }
  0x68   : > { %300 = vrot.lane.b32.xlu1 %v153_v27, %s669_s22  ;;  %298 = vrot.lane.b32.xlu0 %v152_v28, %s669_s22 }
  0x6c   : > { %304 = vrot.lane.b32.xlu1 %v155_v29, %s669_s22  ;;  %302 = vrot.lane.b32.xlu0 %v154_v30, %s669_s22 }
  0x70   : > { %308 = vrot.lane.b32.xlu1 %v157_v31, %s669_s22  ;;  %306 = vrot.lane.b32.xlu0 %v774_v32, %s669_s22 }
  0xa6   : > { %v179_v33 = vpop.permute.xlu1 %178  ;;  %v175_v34 = vpop.permute.xlu0 %174 }
  0xa7   : > { %v198_v53 = vadd.f32 %v175_v34, %v150_v26  ;;  %v200_v1 = vadd.f32 %v179_v33, %v152_v28 }
  0xaa   : > { %v181_v35 = vpop.permute.xlu1 %180  ;;  %v177_v36 = vpop.permute.xlu0 %176 }
  0xab   : > { %v199_v54 = vadd.f32 %v177_v36, %v151_v25  ;;  %v201_v2 = vadd.f32 %v181_v35, %v153_v27 }
  0xae   : > { %v185_v37 = vpop.permute.xlu1 %184  ;;  %v183_v38 = vpop.permute.xlu0 %182 }
  0xaf   : > { %v203_v9 = vadd.f32 %v185_v37, %v155_v29  ;;  %v202_v10 = vadd.f32 %v183_v38, %v154_v30 }
  0xb2   : > { %v225_v39 = vpop.permute.xlu1 %224  ;;  %v223_v40 = vpop.permute.xlu0 %222 }
  0xb3   : > { %v247_v57 = vadd.f32 %v225_v39, %v199_v54  ;;  %v246_v58 = vadd.f32 %v223_v40, %v198_v53 }
  0xb6   : > { %v189_v41 = vpop.permute.xlu1 %188  ;;  %v187_v42 = vpop.permute.xlu0 %186 }
  0xb7   : > { %v205_v20 = vadd.f32 %v189_v41, %v157_v31  ;;  %v204_v23 = vadd.f32 %v187_v42, %v774_v32 }
  0xba   : > { %v229_v43 = vpop.permute.xlu1 %228  ;;  %v227_v44 = vpop.permute.xlu0 %226 }
  0xbb   : > { %v249_v5 = vadd.f32 %v229_v43, %v201_v2  ;;  %v248_v6 = vadd.f32 %v227_v44, %v200_v1 }
  0xbe   : > { %v233_v45 = vpop.permute.xlu1 %232  ;;  %v231_v46 = vpop.permute.xlu0 %230 }
  0xbf   : > { %v251_v15 = vadd.f32 %v233_v45, %v203_v9  ;;  %v250_v16 = vadd.f32 %v231_v46, %v202_v10 }
  0xc2   : > { %v257_v47 = vpop.permute.xlu1 %256  ;;  %v255_v48 = vpop.permute.xlu0 %254 }
  0xc3   : > { %v279_v59 = vadd.f32 %v257_v47, %v247_v57  ;;  %v278_v60 = vadd.f32 %v255_v48, %v246_v58 }
  0xc6   : > { %v237_v49 = vpop.permute.xlu1 %236  ;;  %v235_v50 = vpop.permute.xlu0 %234 }
  0xc7   : > { %v253_v30 = vadd.f32 %v237_v49, %v205_v20  ;;  %v252_v36 = vadd.f32 %v235_v50, %v204_v23 }
  0xca   : > { %v261_v51 = vpop.permute.xlu1 %260  ;;  %v259_v52 = vpop.permute.xlu0 %258 }
  0xcb   : > { %v281_v7 = vadd.f32 %v261_v51, %v249_v5  ;;  %v280_v8 = vadd.f32 %v259_v52, %v248_v6 }
  0xce   : > { %v265_v55 = vpop.permute.xlu1 %264  ;;  %v263_v56 = vpop.permute.xlu0 %262 }
  0xcf   : > { %v283_v24 = vadd.f32 %v265_v55, %v251_v15  ;;  %v282_v25 = vadd.f32 %v263_v56, %v250_v16 }
  0xd2   : > { %v297_v61 = vpop.permute.xlu1 %296  ;;  %v295_v62 = vpop.permute.xlu0 %294 }
  0xd3   : > { %v319_v63 = vadd.f32 %v297_v61, %v279_v59  ;;  %v318_v0 = vadd.f32 %v295_v62, %v278_v60 }
  0xd5   : > { %336 = vst.msk [vmem:[#allocation2 + $0x8] sm:$0xff] %vm334_vm0, %v319_v63  ;;  %335 = vst.msk [vmem:[#allocation2] sm:$0xff] %vm334_vm0, %v318_v0 }
  0xd6   : > { %v269_v3 = vpop.permute.xlu1 %268  ;;  %v267_v4 = vpop.permute.xlu0 %266 }
  0xd7   : > { %v285_v44 = vadd.f32 %v269_v3, %v253_v30  ;;  %v284_v47 = vadd.f32 %v267_v4, %v252_v36 }
  0xda   : > { %v301_v11 = vpop.permute.xlu1 %300  ;;  %v299_v12 = vpop.permute.xlu0 %298 }
  0xdb   : > { %v321_v13 = vadd.f32 %v301_v11, %v281_v7  ;;  %v320_v14 = vadd.f32 %v299_v12, %v280_v8 }
  0xdc   : > { %v344_v17 = vld [vmem:[#allocation2 + $0x8] sm:$0xf]  ;;  %v343_v27 = vld [vmem:[#allocation2] sm:$0xff]  ;;  %v432_v34 = vld [vmem:[#allocation2 + $0xc] sm:$0xf] }
  0xdd   : > { %v360_v18 = vld [vmem:[#allocation2 + $0x9] sm:$0xf]  ;;  %v352_v21 = vmul.f32 0.120078385, %v344_v17  ;;  %338 = vst.msk [vmem:[#allocation2 + $0x18] sm:$0xff] %vm334_vm0, %v321_v13  ;;  %337 = vst.msk [vmem:[#allocation2 + $0x10] sm:$0xff] %vm334_vm0, %v320_v14 }
  0xde   : > { %v384_v19 = vld [vmem:[#allocation2 + $0xa] sm:$0xf]  ;;  %v368_v22 = vmul.f32 0.23388076, %v360_v18  ;;  %v305_v28 = vpop.permute.xlu1 %304  ;;  %v303_v29 = vpop.permute.xlu0 %302  ;;  %v351_v35 = vmul.f32 0.120078385, %v343_v27 }
  0xdf   : > { %v408_v26 = vld [vmem:[#allocation2 + $0xb] sm:$0xf]  ;;  %v392_v31 = vmul.f32 0.2920817, %v384_v19  ;;  %v359_v37 = vld [vmem:[#allocation2 + $0x1] sm:$0xff]  ;;  %v323_v40 = vadd.f32 %v305_v28, %v283_v24  ;;  %v322_v41 = vadd.f32 %v303_v29, %v282_v25 }
  0xe0   : > { %v376_v33 = vadd.f32 %v368_v22, %v352_v21  ;;  %v383_v38 = vld [vmem:[#allocation2 + $0x2] sm:$0xff]  ;;  %v416_v42 = vmul.f32 0.23388076, %v408_v26  ;;  %v367_v43 = vmul.f32 0.23388076, %v359_v37 }
  0xe1   : > { %v407_v39 = vld [vmem:[#allocation2 + $0x3] sm:$0xff]  ;;  %v440_v45 = vmul.f32 0.120078385, %v432_v34  ;;  %v391_v46 = vmul.f32 0.2920817, %v383_v38  ;;  %340 = vst.msk [vmem:[#allocation2 + $0x28] sm:$0xff] %vm334_vm0, %v323_v40 }
  0xe2   : > { %v400_v32 = vadd.f32 %v392_v31, %v376_v33  ;;  %339 = vst.msk [vmem:[#allocation2 + $0x20] sm:$0xff] %vm334_vm0, %v322_v41  ;;  %v309_v48 = vpop.permute.xlu1 %308  ;;  %v307_v49 = vpop.permute.xlu0 %306  ;;  %v375_v51 = vadd.f32 %v367_v43, %v351_v35  ;;  %v415_v52 = vmul.f32 0.23388076, %v407_v39  ;;  %v431_v53 = vld [vmem:[#allocation2 + $0x4] sm:$0xff] }
  0xe3   : > { %v325_v54 = vadd.f32 %v309_v48, %v285_v44  ;;  %v324_v58 = vadd.f32 %v307_v49, %v284_v47  ;;  %v439_v63 = vmul.f32 0.120078385, %v431_v53 }
  0xe4   : > { %v424_v50 = vadd.f32 %v416_v42, %v400_v32  ;;  %v346_v55 = vld [vmem:[#allocation2 + $0x18] sm:$0xf]  ;;  %v399_v60 = vadd.f32 %v391_v46, %v375_v51  ;;  %v345_v4 = vld [vmem:[#allocation2 + $0x10] sm:$0xff]  ;;  %v434_v7 = vld [vmem:[#allocation2 + $0x1c] sm:$0xf] }
  0xe5   : > { %v362_v56 = vld [vmem:[#allocation2 + $0x19] sm:$0xf]  ;;  %v354_v61 = vmul.f32 0.120078385, %v346_v55  ;;  %342 = vst.msk [vmem:[#allocation2 + $0x38] sm:$0xff] %vm334_vm0, %v325_v54  ;;  %341 = vst.msk [vmem:[#allocation2 + $0x30] sm:$0xff] %vm334_vm0, %v324_v58 }
  0xe6   : > { %v386_v57 = vld [vmem:[#allocation2 + $0x1a] sm:$0xf]  ;;  %v448_v59 = vadd.f32 %v440_v45, %v424_v50  ;;  %v370_v62 = vmul.f32 0.23388076, %v362_v56  ;;  %v423_v1 = vadd.f32 %v415_v52, %v399_v60  ;;  %v361_v5 = vld [vmem:[#allocation2 + $0x11] sm:$0xff] }
  0xe7   : > { %v410_v0 = vld [vmem:[#allocation2 + $0x1b] sm:$0xf]  ;;  %v394_v3 = vmul.f32 0.2920817, %v386_v57  ;;  %v385_v6 = vld [vmem:[#allocation2 + $0x12] sm:$0xff] }
  0xe8   : > { %456 = vst [vmem:[%s792_s25 + $0x8] sm:$0xf] %v448_v59  ;;  %v378_v2 = vadd.f32 %v370_v62, %v354_v61  ;;  %v353_v8 = vmul.f32 0.120078385, %v345_v4  ;;  %v369_v9 = vmul.f32 0.23388076, %v361_v5  ;;  %v447_v10 = vadd.f32 %v439_v63, %v423_v1 }
  0xe9   : > { %v418_v12 = vmul.f32 0.23388076, %v410_v0  ;;  %v409_v13 = vld [vmem:[#allocation2 + $0x13] sm:$0xff]  ;;  %v348_v14 = vld [vmem:[#allocation2 + $0x28] sm:$0xf]  ;;  %v347_v30 = vld [vmem:[#allocation2 + $0x20] sm:$0xff] }
  0xea   : > { %v402_v11 = vadd.f32 %v394_v3, %v378_v2  ;;  %v377_v15 = vadd.f32 %v369_v9, %v353_v8  ;;  %v393_v16 = vmul.f32 0.2920817, %v385_v6  ;;  %v433_v17 = vld [vmem:[#allocation2 + $0x14] sm:$0xff]  ;;  %v356_v18 = vmul.f32 0.120078385, %v348_v14  ;;  %455 = vst [vmem:[%s792_s25] sm:$0xff] %v447_v10  ;;  %v363_v33 = vld [vmem:[#allocation2 + $0x21] sm:$0xff] }
  0xeb   : > { %v442_v20 = vmul.f32 0.120078385, %v434_v7  ;;  %v364_v21 = vld [vmem:[#allocation2 + $0x29] sm:$0xf]  ;;  %v417_v24 = vmul.f32 0.23388076, %v409_v13 }
  0xec   : > { %v426_v19 = vadd.f32 %v418_v12, %v402_v11  ;;  %v388_v22 = vld [vmem:[#allocation2 + $0x2a] sm:$0xf]  ;;  %v401_v23 = vadd.f32 %v393_v16, %v377_v15  ;;  %v372_v25 = vmul.f32 0.23388076, %v364_v21  ;;  %v441_v28 = vmul.f32 0.120078385, %v433_v17 }
  0xed   : > { %v412_v26 = vld [vmem:[#allocation2 + $0x2b] sm:$0xf]  ;;  %v396_v35 = vmul.f32 0.2920817, %v388_v22  ;;  %v355_v36 = vmul.f32 0.120078385, %v347_v30 }
  0xee   : > { %v450_v27 = vadd.f32 %v442_v20, %v426_v19  ;;  %v436_v29 = vld [vmem:[#allocation2 + $0x2c] sm:$0xf]  ;;  %v425_v31 = vadd.f32 %v417_v24, %v401_v23  ;;  %v380_v34 = vadd.f32 %v372_v25, %v356_v18  ;;  %v387_v37 = vld [vmem:[#allocation2 + $0x22] sm:$0xff]  ;;  %v420_v38 = vmul.f32 0.23388076, %v412_v26  ;;  %v349_v57 = vld [vmem:[#allocation2 + $0x30] sm:$0xff] }
  0xef   : > { %v444_v39 = vmul.f32 0.120078385, %v436_v29  ;;  %v371_v40 = vmul.f32 0.23388076, %v363_v33  ;;  %v411_v42 = vld [vmem:[#allocation2 + $0x23] sm:$0xff]  ;;  %v365_v58 = vld [vmem:[#allocation2 + $0x31] sm:$0xff] }
  0xf0   : > { %458 = vst [vmem:[%s792_s25 + $0x18] sm:$0xf] %v450_v27  ;;  %v449_v41 = vadd.f32 %v441_v28, %v425_v31  ;;  %v404_v32 = vadd.f32 %v396_v35, %v380_v34  ;;  %v350_v43 = vld [vmem:[#allocation2 + $0x38] sm:$0xf]  ;;  %v395_v46 = vmul.f32 0.2920817, %v387_v37 }
  0xf1   : > { %v366_v44 = vld [vmem:[#allocation2 + $0x39] sm:$0xf]  ;;  %v379_v45 = vadd.f32 %v371_v40, %v355_v36  ;;  %v358_v47 = vmul.f32 0.120078385, %v350_v43  ;;  %v435_v50 = vld [vmem:[#allocation2 + $0x24] sm:$0xff] }
  0xf2   : > { %v374_v48 = vmul.f32 0.23388076, %v366_v44  ;;  %457 = vst [vmem:[%s792_s25 + $0x10] sm:$0xff] %v449_v41  ;;  %v428_v49 = vadd.f32 %v420_v38, %v404_v32  ;;  %v390_v51 = vld [vmem:[#allocation2 + $0x3a] sm:$0xf]  ;;  %v389_v3 = vld [vmem:[#allocation2 + $0x32] sm:$0xff] }
  0xf3   : > { %v414_v52 = vld [vmem:[#allocation2 + $0x3b] sm:$0xf]  ;;  %v403_v53 = vadd.f32 %v395_v46, %v379_v45  ;;  %v419_v54 = vmul.f32 0.23388076, %v411_v42  ;;  %v398_v56 = vmul.f32 0.2920817, %v390_v51 }
  0xf4   : > { %v382_v55 = vadd.f32 %v374_v48, %v358_v47  ;;  %v452_v59 = vadd.f32 %v444_v39, %v428_v49  ;;  %v438_v60 = vld [vmem:[#allocation2 + $0x3c] sm:$0xf]  ;;  %v357_v61 = vmul.f32 0.120078385, %v349_v57  ;;  %v373_v62 = vmul.f32 0.23388076, %v365_v58 }
  0xf5   : > { %v427_v63 = vadd.f32 %v419_v54, %v403_v53  ;;  %v443_v0 = vmul.f32 0.120078385, %v435_v50  ;;  %v422_v2 = vmul.f32 0.23388076, %v414_v52  ;;  %v413_v4 = vld [vmem:[#allocation2 + $0x33] sm:$0xff] }
  0xf6   : > { %v406_v1 = vadd.f32 %v398_v56, %v382_v55  ;;  %460 = vst [vmem:[%s792_s25 + $0x28] sm:$0xf] %v452_v59  ;;  %v381_v5 = vadd.f32 %v373_v62, %v357_v61  ;;  %v397_v6 = vmul.f32 0.2920817, %v389_v3  ;;  %v446_v9 = vmul.f32 0.120078385, %v438_v60 }
  0xf7   : > { %v451_v7 = vadd.f32 %v443_v0, %v427_v63  ;;  %v437_v10 = vld [vmem:[#allocation2 + $0x34] sm:$0xff]  ;;  %v421_v12 = vmul.f32 0.23388076, %v413_v4 }
  0xf8   : > { %v430_v8 = vadd.f32 %v422_v2, %v406_v1  ;;  %v405_v11 = vadd.f32 %v397_v6, %v381_v5  ;;  %v445_v15 = vmul.f32 0.120078385, %v437_v10 }
  0xf9   : > { %459 = vst [vmem:[%s792_s25 + $0x20] sm:$0xff] %v451_v7 }
  0xfa   : > { %v454_v13 = vadd.f32 %v446_v9, %v430_v8  ;;  %v429_v14 = vadd.f32 %v421_v12, %v405_v11 }
  0xfc   : > { %462 = vst [vmem:[%s792_s25 + $0x38] sm:$0xf] %v454_v13  ;;  %v453_v16 = vadd.f32 %v445_v15, %v429_v14 }
  0xfe   : > { %461 = vst [vmem:[%s792_s25 + $0x30] sm:$0xff] %v453_v16 }
  0xff PF: > { %p11_p8 = scmp.ge.s32.totalorder %s700_s11, 4   ;;  %s822_s6 = smov %s652_s7 }
 0x100   : > { %s823_s7 = smov %s656_s8  ;;  %s824_s8 = smov %s710_s14 }
 0x101   : > { %s825_s9 = smov %s700_s11  ;;  %13 = sbr.rel (!%p11_p8) target bundleno = 3 (0x3), region = 64 }
 0x108   :  { %487 = vsyncpa [#allocation4], 1 }
 0x109   :  { %489 = vsyncpa [#allocation4 + $0x1], 1 }

</bundles_post_ra>
